<compile_context>
chip_gen: v7x
topology: tpu7x:2x2x1
jax: 0.10.0
libtpu: 0.0.40
codegen_flags: <defaults>
</compile_context>

<pallas_src>
import jax
import jax.numpy as jnp
from jax.experimental import pallas as pl
from jax.experimental.pallas import tpu as pltpu


# ----------------------------------------------------------------------------
# Fused Pallas kernel: GCN1 -> (dropout=id) -> GCN2 -> BatchNorm1d
#   a_ref  : (N, N)      bf16   normalized adjacency A_hat
#   ax_ref : (N, ninp)   bf16   precomputed A_hat @ X   (forward-invariant)
#   w1_ref : (ninp, 2*ninp) bf16
#   b1_ref : (1, 2*ninp) f32
#   w2_ref : (2*ninp, ninp) bf16
#   b2_ref : (1, ninp)   f32
#   o_ref  : (N, ninp)   f32
# ----------------------------------------------------------------------------
def _graph_nn_fused_kernel(a_ref, ax_ref, w1_ref, b1_ref, w2_ref, b2_ref, o_ref):
    # ---- Layer 1: H1 = (A_hat @ X) @ W1 + b1, with A_hat @ X hoisted --------
    h1 = jnp.dot(ax_ref[...], w1_ref[...],
                 preferred_element_type=jnp.float32)             # (N, 2*ninp) f32
    h1 = h1 + b1_ref[...]

    # TODO(synk): nn.Dropout(0.5) in training mode would mask h1 here;
    # inference mode => identity.

    # ---- Layer 2: H2 = A_hat @ (H1 @ W2) + b2 -------------------------------
    # Contract the feature matmul first so only the narrow (N, ninp) product
    # feeds the (N, N) aggregation (keeps the resident intermediate small).
    h1w2 = jnp.dot(h1.astype(jnp.bfloat16), w2_ref[...],
                   preferred_element_type=jnp.float32)           # (N, ninp) f32
    h2 = jnp.dot(a_ref[...], h1w2.astype(jnp.bfloat16),
                 preferred_element_type=jnp.float32)             # (N, ninp) f32
    h2 = h2 + b2_ref[...]

    # ---- BatchNorm1d (training-mode batch stats, gamma=1, beta=0) -----------
    # One-pass statistics: var = E[x^2] - mean^2 (biased, as PyTorch BN),
    # clamped at 0 to guard against f32 cancellation.
    inv_n = 1.0 / h2.shape[0]
    s = jnp.sum(h2, axis=0, keepdims=True)
    ss = jnp.sum(h2 * h2, axis=0, keepdims=True)
    mean = s * inv_n
    var = jnp.maximum(ss * inv_n - mean * mean, 0.0)
    o_ref[...] = (h2 - mean) * jax.lax.rsqrt(var + 1e-5)


# ----------------------------------------------------------------------------
# Wrappers
# ----------------------------------------------------------------------------
def precompute_graph_constants(params, edge_index, num_nodes):
    """Forward-invariant (inference) constants: A_hat and AX = A_hat @ X.

    Both depend only on the graph structure and the frozen embedding table, so
    they are computed ONCE outside the per-forward path, already cast to the
    bf16 MXU operand dtype.
    """
    a_hat = normalized_adjacency(edge_index, num_nodes)          # (N, N) f32
    ax = jnp.dot(a_hat, params["embedding"])                     # (N, ninp) f32
    return a_hat.astype(jnp.bfloat16), ax.astype(jnp.bfloat16)


def graph_nn_forward(params, a_hat_bf16, ax_bf16):
    """Fused forward as a single pallas_call (all operands VMEM-resident)."""
    w1, b1 = params["w1"], params["b1"]           # (ninp, 2*ninp), (2*ninp,)
    w2, b2 = params["w2"], params["b2"]           # (2*ninp, ninp), (ninp,)

    n = a_hat_bf16.shape[0]
    f_in = ax_bf16.shape[1]
    f_mid = w1.shape[1]
    f_out = w2.shape[1]

    w1_bf16 = w1.astype(jnp.bfloat16)
    w2_bf16 = w2.astype(jnp.bfloat16)
    b1_2d = b1.reshape(1, f_mid).astype(jnp.float32)
    b2_2d = b2.reshape(1, f_out).astype(jnp.float32)

    return pl.pallas_call(
        _graph_nn_fused_kernel,
        out_shape=jax.ShapeDtypeStruct((n, f_out), jnp.float32),
        in_specs=[
            pl.BlockSpec((n, n), lambda: (0, 0)),          # A_hat (bf16)
            pl.BlockSpec((n, f_in), lambda: (0, 0)),       # AX    (bf16)
            pl.BlockSpec((f_in, f_mid), lambda: (0, 0)),   # W1    (bf16)
            pl.BlockSpec((1, f_mid), lambda: (0, 0)),      # b1    (f32)
            pl.BlockSpec((f_mid, f_out), lambda: (0, 0)),  # W2    (bf16)
            pl.BlockSpec((1, f_out), lambda: (0, 0)),      # b2    (f32)
        ],
        out_specs=pl.BlockSpec((n, f_out), lambda: (0, 0)),
        compiler_params=pltpu.CompilerParams(vmem_limit_bytes=32 * 1024 * 1024),
    )(a_hat_bf16, ax_bf16, w1_bf16, b1_2d, w2_bf16, b2_2d)


def normalized_adjacency(edge_index, num_nodes):
    """A_hat = D^{-1/2} (A + I) D^{-1/2}  (dense, plain-JAX glue).

    Depends only on the graph structure -> compute ONCE, outside the
    per-forward path.  The diagonal is clamped to 1 so that graphs with
    explicit self-loops don't double-count them in the normalization (a
    deliberate, documented divergence from PyG's gcn_norm for such graphs).
    """
    src, dst = edge_index[0], edge_index[1]
    a = jnp.zeros((num_nodes, num_nodes), jnp.float32)
    a = a.at[dst, src].set(1.0)                                  # message src -> dst
    eye = jnp.eye(num_nodes, dtype=jnp.float32)
    a = jnp.maximum(a, eye)                                      # add self loops
    deg = jnp.sum(a, axis=1)
    d_inv_sqrt = jnp.where(deg > 0, jax.lax.rsqrt(deg), 0.0)
    return a * d_inv_sqrt[:, None] * d_inv_sqrt[None, :]


def xavier_normal(key, shape):
    fan_in, fan_out = shape
    std = (2.0 / (fan_in + fan_out)) ** 0.5
    return std * jax.random.normal(key, shape, dtype=jnp.float32)


# ----------------------------------------------------------------------------
# Main
# ----------------------------------------------------------------------------
if __name__ == "__main__":
    ntoken = 128     # number of graph nodes / vocabulary size
    ninp = 32        # embedding / hidden size

    key = jax.random.PRNGKey(0)
    k_emb, k_w1, k_w2 = jax.random.split(key, 3)

    params = {
        "embedding": xavier_normal(k_emb, (ntoken, ninp)),
        "w1": xavier_normal(k_w1, (ninp, 2 * ninp)),
        "b1": jnp.zeros((2 * ninp,), jnp.float32),
        "w2": xavier_normal(k_w2, (2 * ninp, ninp)),
        "b2": jnp.zeros((ninp,), jnp.float32),
    }

    # Deterministic synthetic edge_index: a bidirectional ring over the nodes.
    idx = jnp.arange(ntoken, dtype=jnp.int32)
    nxt = (idx + 1) % ntoken
    edge_index = jnp.stack(
        [jnp.concatenate([idx, nxt]), jnp.concatenate([nxt, idx])], axis=0
    )  # (2, 2*ntoken)

    # Forward-invariant constants (structure + frozen embedding), computed once.
    a_hat_bf16, ax_bf16 = precompute_graph_constants(params, edge_index, ntoken)
    a_hat_bf16 = jax.block_until_ready(a_hat_bf16)
    ax_bf16 = jax.block_until_ready(ax_bf16)

    out = graph_nn_forward(params, a_hat_bf16, ax_bf16)
    out = jax.block_until_ready(out)
    assert out.shape == (ntoken, ninp)
    assert jnp.all(jnp.isfinite(out))
    print("KERNEL_OK")
</pallas_src>

<mosaic_0001>
module attributes {stable_mosaic.version = 11 : i64} {
  func.func @_graph_nn_fused_kernel(%arg0: memref<128x128xbf16, #tpu.memory_space<vmem>>, %arg1: memref<128x32xbf16, #tpu.memory_space<vmem>>, %arg2: memref<32x64xbf16, #tpu.memory_space<vmem>>, %arg3: memref<1x64xf32, #tpu.memory_space<vmem>>, %arg4: memref<64x32xbf16, #tpu.memory_space<vmem>>, %arg5: memref<1x32xf32, #tpu.memory_space<vmem>>, %arg6: memref<128x32xf32, #tpu.memory_space<vmem>>) attributes {dimension_semantics = [], scalar_prefetch = 0 : i64, scratch_operands = 0 : i64, tpu.core_type = #tpu.core_type<tc>} {
    %c0 = arith.constant 0 : index
    %c0_0 = arith.constant 0 : index
    %0 = vector.load %arg1[%c0, %c0_0] : memref<128x32xbf16, #tpu.memory_space<vmem>>, vector<128x32xbf16>
    %c0_1 = arith.constant 0 : index
    %c0_2 = arith.constant 0 : index
    %1 = vector.load %arg2[%c0_1, %c0_2] : memref<32x64xbf16, #tpu.memory_space<vmem>>, vector<32x64xbf16>
    %cst = arith.constant dense<0.000000e+00> : vector<128x64xf32>
    %2 = tpu.matmul %0, %1, %cst {dimension_numbers = #tpu.dot_dimension_numbers<[1], [0], [0], [1], [0, 0, 1, 1], [], []>} : vector<128x32xbf16>, vector<32x64xbf16>, vector<128x64xf32> -> vector<128x64xf32>
    %c0_3 = arith.constant 0 : index
    %c0_4 = arith.constant 0 : index
    %3 = vector.load %arg3[%c0_3, %c0_4] : memref<1x64xf32, #tpu.memory_space<vmem>>, vector<1x64xf32>
    %4 = vector.broadcast %3 : vector<1x64xf32> to vector<128x64xf32>
    %5 = arith.addf %2, %4 : vector<128x64xf32>
    %6 = arith.truncf %5 : vector<128x64xf32> to vector<128x64xbf16>
    %c0_5 = arith.constant 0 : index
    %c0_6 = arith.constant 0 : index
    %7 = vector.load %arg4[%c0_5, %c0_6] : memref<64x32xbf16, #tpu.memory_space<vmem>>, vector<64x32xbf16>
    %cst_7 = arith.constant dense<0.000000e+00> : vector<128x32xf32>
    %8 = tpu.matmul %6, %7, %cst_7 {dimension_numbers = #tpu.dot_dimension_numbers<[1], [0], [0], [1], [0, 0, 1, 1], [], []>} : vector<128x64xbf16>, vector<64x32xbf16>, vector<128x32xf32> -> vector<128x32xf32>
    %c0_8 = arith.constant 0 : index
    %c0_9 = arith.constant 0 : index
    %9 = vector.load %arg0[%c0_8, %c0_9] : memref<128x128xbf16, #tpu.memory_space<vmem>>, vector<128x128xbf16>
    %10 = arith.truncf %8 : vector<128x32xf32> to vector<128x32xbf16>
    %cst_10 = arith.constant dense<0.000000e+00> : vector<128x32xf32>
    %11 = tpu.matmul %9, %10, %cst_10 {dimension_numbers = #tpu.dot_dimension_numbers<[1], [0], [0], [1], [0, 0, 1, 1], [], []>} : vector<128x128xbf16>, vector<128x32xbf16>, vector<128x32xf32> -> vector<128x32xf32>
    %c0_11 = arith.constant 0 : index
    %c0_12 = arith.constant 0 : index
    %12 = vector.load %arg5[%c0_11, %c0_12] : memref<1x32xf32, #tpu.memory_space<vmem>>, vector<1x32xf32>
    %13 = vector.broadcast %12 : vector<1x32xf32> to vector<128x32xf32>
    %14 = arith.addf %11, %13 : vector<128x32xf32>
    %cst_13 = arith.constant dense<0.000000e+00> : vector<32xf32>
    %15 = vector.multi_reduction <add>, %14, %cst_13 [0] : vector<128x32xf32> to vector<32xf32>
    %16 = vector.shape_cast %15 : vector<32xf32> to vector<1x32xf32>
    %17 = arith.mulf %14, %14 : vector<128x32xf32>
    %cst_14 = arith.constant dense<0.000000e+00> : vector<32xf32>
    %18 = vector.multi_reduction <add>, %17, %cst_14 [0] : vector<128x32xf32> to vector<32xf32>
    %19 = vector.shape_cast %18 : vector<32xf32> to vector<1x32xf32>
    %cst_15 = arith.constant 7.812500e-03 : f32
    %20 = vector.broadcast %cst_15 : f32 to vector<1x32xf32>
    %21 = arith.mulf %16, %20 : vector<1x32xf32>
    %cst_16 = arith.constant 7.812500e-03 : f32
    %22 = vector.broadcast %cst_16 : f32 to vector<1x32xf32>
    %23 = arith.mulf %19, %22 : vector<1x32xf32>
    %24 = arith.mulf %21, %21 : vector<1x32xf32>
    %25 = arith.subf %23, %24 : vector<1x32xf32>
    %cst_17 = arith.constant 0.000000e+00 : f32
    %26 = vector.broadcast %cst_17 : f32 to vector<1x32xf32>
    %27 = arith.maximumf %25, %26 : vector<1x32xf32>
    %28 = vector.broadcast %21 : vector<1x32xf32> to vector<128x32xf32>
    %29 = arith.subf %14, %28 : vector<128x32xf32>
    %cst_18 = arith.constant 9.99999974E-6 : f32
    %30 = vector.broadcast %cst_18 : f32 to vector<1x32xf32>
    %31 = arith.addf %27, %30 : vector<1x32xf32>
    %32 = math.rsqrt %31 : vector<1x32xf32>
    %33 = vector.broadcast %32 : vector<1x32xf32> to vector<128x32xf32>
    %34 = arith.mulf %29, %33 : vector<128x32xf32>
    %c0_19 = arith.constant 0 : index
    %c0_20 = arith.constant 0 : index
    %35 = vector.load %arg6[%c0_19, %c0_20] : memref<128x32xf32, #tpu.memory_space<vmem>>, vector<128x32xf32>
    tpu.vector_store %arg6[%c0_19, %c0_20], %34 {strides = array<i32>} : memref<128x32xf32, #tpu.memory_space<vmem>>, vector<128x32xf32>,
    return
  }
}

</mosaic_0001>

<bundles_post_ra>
// kernel: tpu_custom_call.1
= control target key start
LH: loop header
LB: loop body
LE: loop exit
PB: predicated region body
PF: predicated region fallthrough
CT: control target
= control target key end

     0   :  { %vm103_vm0 = vcmask 261120   ;;  %vm265_vm1 = vcmask 523264   ;;  %s1251_s2 = inlined_call_operand.vmem [shape: bf16[32,64], index: 2, kind: input, shape index: {}]   ;;  %s1252_s1 = inlined_call_operand.vmem [shape: bf16[128,32], index: 1, kind: input, shape index: {}]   ;;  %s1253_s4 = inlined_call_operand.vmem [shape: bf16[64,32], index: 4, kind: input, shape index: {}]   ;;  %s1254_s3 = inlined_call_operand.vmem [shape: f32[1,64], index: 3, kind: input, shape index: {}]   ;;  %s1255_s0 = inlined_call_operand.vmem [shape: bf16[128,128], index: 0, kind: input, shape index: {}]   ;;  %s1256_s5 = inlined_call_operand.vmem [shape: f32[1,32], index: 5, kind: input, shape index: {}]   ;;  %s1257_s6 = inlined_call_operand.vmem [shape: f32[128,32], index: 6, kind: output, shape index: {}]  }
   0x1   :  { %v882_v0 = vld [vmem:[%s1251_s2] sm:$0xff]   ;;  %v883_v1 = vld [vmem:[%s1251_s2 + $0x8] sm:$0xff]   ;;  %v886_v4 = vld [vmem:[%s1252_s1 + $0x10] sm:$0xff]  }
   0x2   :  { %790 = vmatprep.subr.bf16.mxu0 %v882_v0  ;;  %v884_v2 = vld [vmem:[%s1252_s1] sm:$0xff]   ;;  %v885_v3 = vld [vmem:[%s1252_s1 + $0x8] sm:$0xff]   ;;  %v887_v7 = vld [vmem:[%s1252_s1 + $0x18] sm:$0xff]  }
   0x3   :  { %791 = vmatpush3.bf16.msra.mxu0 %v882_v0  ;;  %794 = vmatprep.mubr.msk.bf16.mxu0 %vm103_vm0, %v884_v2  ;;  %v892_v5 = vld [vmem:[%s1253_s4] sm:$0xff]   ;;  %v893_v6 = vld [vmem:[%s1253_s4 + $0x8] sm:$0xff]   ;;  %v890_v10 = vld [vmem:[%s1252_s1 + $0x30] sm:$0xff]  }
   0x4   :  { %792 = vmatprep.subr.bf16.mxu0 %v883_v1  ;;  %810 = vmatprep.subr.bf16.mxu1 %v892_v5  ;;  %v888_v8 = vld [vmem:[%s1252_s1 + $0x20] sm:$0xff]   ;;  %v889_v9 = vld [vmem:[%s1252_s1 + $0x28] sm:$0xff]   ;;  %v891_v11 = vld [vmem:[%s1252_s1 + $0x38] sm:$0xff]  }
   0x5   :  { %811 = vmatpush3.bf16.msra.mxu1 %v892_v5  ;;  %v894_v12 = vld [vmem:[%s1253_s4 + $0x10] sm:$0xff]   ;;  %v895_v13 = vld [vmem:[%s1253_s4 + $0x18] sm:$0xff]   ;;  %v712_v15 = vld [vmem:[%s1254_s3] ss:$0 sm:$0xff] }
   0x6   :  { %812 = vmatprep.subr.bf16.mxu1 %v893_v6  ;;  %v896_v55 = vld [vmem:[%s1255_s0] sm:$0xff]   ;;  %v902_v56 = vld [vmem:[%s1255_s0 + $0x30] sm:$0xff]  }
   0x7   :  { %793 = vmatpush3.bf16.msra.mxu0 %v883_v1 }
   0x9   :  { %813 = vmatpush3.bf16.msra.mxu1 %v893_v6 }
   0xa   :  { %795 = vmatmul.mubr.msk.bf16.vlgmr.msra.gmra.mrb[0].mxu0 %vm103_vm0, %v885_v3  ;;  %814 = vmatprep.subr.bf16.mxu1 %v894_v12 }
   0xb   :  { %798 = vmatprep.mubr.msk.bf16.mxu0 %vm103_vm0, %v886_v4 }
   0xd   :  { %815 = vmatpush3.bf16.msra.mxu1 %v894_v12 }
   0xe   :  { %816 = vmatprep.subr.bf16.mxu1 %v895_v13 }
  0x11   :  { %817 = vmatpush3.bf16.msra.mxu1 %v895_v13 }
  0x12   :  { %799 = vmatmul.mubr.msk.bf16.gmra.mrb[4].mxu0 %vm103_vm0, %v887_v7 }
  0x13   :  { %802 = vmatprep.mubr.msk.bf16.mxu0 %vm103_vm0, %v888_v8 }
  0x1a   :  { %803 = vmatmul.mubr.msk.bf16.gmra.mrb[8].mxu0 %vm103_vm0, %v889_v9 }
  0x1b   :  { %806 = vmatprep.mubr.msk.bf16.mxu0 %vm103_vm0, %v890_v10 }
  0x22   :  { %807 = vmatmul.mubr.msk.bf16.gmra.mrb[12].mxu0 %vm103_vm0, %v891_v11 }
  0x23   :  { %850 = vmatprep.mubr.bf16.mxu0 %v896_v55 }
  0xdd   :  { %v796_v14 = vpop.f32.mrb[0].mxu0 }
  0xde   :  { %v162_v16 = vpop.f32.mrb[1].mxu0  ;;  %v171_v18 = vadd.f32 %v796_v14, %v712_v15 }
  0xdf   :  { %v797_v17 = vpop.f32.mrb[2].mxu0  ;;  %v163_v21 = vadd.f32 %v712_v15, %v162_v16 }
  0xe0   :  { %v174_v19 = vadd.f32 %v797_v17, %v712_v15  ;;  %v165_v20 = vpop.f32.mrb[3].mxu0  ;;  %v897_v17 = vld [vmem:[%s1255_s0 + $0x8] sm:$0xff]  }
  0xe1   :  { %v166_v22 = vadd.f32 %v712_v15, %v165_v20  ;;  %v899_v20 = vld [vmem:[%s1255_s0 + $0x18] sm:$0xff]  }
  0xe2   :  { %v226_v23 = vpack.c.bf16 %v174_v19, %v171_v18  ;;  %v903_v18 = vld [vmem:[%s1255_s0 + $0x38] sm:$0xff]   ;;  %v898_v19 = vld [vmem:[%s1255_s0 + $0x10] sm:$0xff]  }
  0xe3   :  { %v225_v24 = vpack.c.bf16 %v166_v22, %v163_v21  ;;  %v900_v21 = vld [vmem:[%s1255_s0 + $0x20] sm:$0xff]   ;;  %v901_v22 = vld [vmem:[%s1255_s0 + $0x28] sm:$0xff]  }
  0xe5   :  { %v800_v25 = vpop.f32.mrb[4].mxu0  ;;  %818 = vmatprep.mubr.msk.bf16.mxu1 %vm265_vm1, %v225_v24 }
  0xe6   :  { %v178_v26 = vpop.f32.mrb[5].mxu0  ;;  %819 = vmatmul.mubr.msk.bf16.vlgmr.msra.gmra.mrb[0].mxu1 %vm265_vm1, %v226_v23  ;;  %v187_v28 = vadd.f32 %v800_v25, %v712_v15  ;;  %v1029_v23 = vld [vmem:[%s1256_s5] ss:$0 sm:$0xff] }
  0xe7   :  { %v801_v27 = vpop.f32.mrb[6].mxu0  ;;  %v179_v31 = vadd.f32 %v712_v15, %v178_v26 }
  0xe8   :  { %v190_v29 = vadd.f32 %v801_v27, %v712_v15  ;;  %v181_v30 = vpop.f32.mrb[7].mxu0 }
  0xe9   :  { %v182_v32 = vadd.f32 %v712_v15, %v181_v30 }
  0xea   :  { %v228_v33 = vpack.c.bf16 %v190_v29, %v187_v28 }
  0xeb   :  { %v227_v34 = vpack.c.bf16 %v182_v32, %v179_v31 }
  0xed   :  { %v804_v35 = vpop.f32.mrb[8].mxu0  ;;  %822 = vmatprep.mubr.msk.bf16.mxu1 %vm265_vm1, %v227_v34 }
  0xee   :  { %v194_v36 = vpop.f32.mrb[9].mxu0  ;;  %823 = vmatmul.mubr.msk.bf16.gmra.mrb[4].mxu1 %vm265_vm1, %v228_v33  ;;  %v203_v38 = vadd.f32 %v804_v35, %v712_v15 }
  0xef   :  { %v805_v37 = vpop.f32.mrb[10].mxu0  ;;  %v195_v41 = vadd.f32 %v712_v15, %v194_v36 }
  0xf0   :  { %v206_v39 = vadd.f32 %v805_v37, %v712_v15  ;;  %v197_v40 = vpop.f32.mrb[11].mxu0 }
  0xf1   :  { %v198_v42 = vadd.f32 %v712_v15, %v197_v40 }
  0xf2   :  { %v230_v43 = vpack.c.bf16 %v206_v39, %v203_v38 }
  0xf3   :  { %v229_v44 = vpack.c.bf16 %v198_v42, %v195_v41 }
  0xf5   :  { %v808_v45 = vpop.f32.mrb[12].mxu0  ;;  %826 = vmatprep.mubr.msk.bf16.mxu1 %vm265_vm1, %v229_v44 }
  0xf6   :  { %v210_v46 = vpop.f32.mrb[13].mxu0  ;;  %827 = vmatmul.mubr.msk.bf16.gmra.mrb[8].mxu1 %vm265_vm1, %v230_v43  ;;  %v219_v48 = vadd.f32 %v808_v45, %v712_v15 }
  0xf7   :  { %v809_v47 = vpop.f32.mrb[14].mxu0  ;;  %v211_v51 = vadd.f32 %v712_v15, %v210_v46 }
  0xf8   :  { %v222_v49 = vadd.f32 %v809_v47, %v712_v15  ;;  %v213_v50 = vpop.f32.mrb[15].mxu0 }
  0xf9   :  { %v214_v52 = vadd.f32 %v712_v15, %v213_v50 }
  0xfa   :  { %v232_v53 = vpack.c.bf16 %v222_v49, %v219_v48 }
  0xfb   :  { %v231_v54 = vpack.c.bf16 %v214_v52, %v211_v51 }
  0xfd   :  { %830 = vmatprep.mubr.msk.bf16.mxu1 %vm265_vm1, %v231_v54 }
  0xfe   :  { %831 = vmatmul.mubr.msk.bf16.gmra.mrb[12].mxu1 %vm265_vm1, %v232_v53 }
  0xff   :  { %862 = vmatprep.mubr.bf16.mxu1 %v902_v56 }
 0x1b9   :  { %v820_v57 = vpop.f32.mrb[0].mxu1 }
 0x1ba   :  { %v324_v58 = vpop.f32.mrb[1].mxu1 }
 0x1bb   :  { %v821_v59 = vpop.f32.mrb[2].mxu1 }
 0x1bc   :  { %v404_v60 = vpack.c.bf16 %v821_v59, %v820_v57  ;;  %v327_v61 = vpop.f32.mrb[3].mxu1 }
 0x1bd   :  { %v403_v62 = vpack.c.bf16 %v327_v61, %v324_v58 }
 0x1bf   :  { %834 = vmatprep.subr.bf16.mxu0 %v403_v62  ;;  %866 = vmatprep.subr.bf16.mxu1 %v403_v62 }
 0x1c0   :  { %835 = vmatpush3.bf16.msra.mxu0 %v403_v62  ;;  %874 = vmatpush3.bf16.msra.mxu1 %v403_v62 }
 0x1c1   :  { %v824_v63 = vpop.f32.mrb[4].mxu1  ;;  %836 = vmatprep.subr.bf16.mxu0 %v404_v60  ;;  %867 = vmatprep.subr.bf16.mxu1 %v404_v60 }
 0x1c2   :  { %v340_v0 = vpop.f32.mrb[5].mxu1 }
 0x1c3   :  { %v825_v1 = vpop.f32.mrb[6].mxu1 }
 0x1c4   :  { %v406_v2 = vpack.c.bf16 %v825_v1, %v824_v63  ;;  %v343_v3 = vpop.f32.mrb[7].mxu1  ;;  %837 = vmatpush3.bf16.msra.mxu0 %v404_v60  ;;  %875 = vmatpush3.bf16.msra.mxu1 %v404_v60 }
 0x1c5   :  { %v405_v4 = vpack.c.bf16 %v343_v3, %v340_v0 }
 0x1c7   :  { %838 = vmatprep.subr.bf16.mxu0 %v405_v4  ;;  %868 = vmatprep.subr.bf16.mxu1 %v405_v4 }
 0x1c8   :  { %839 = vmatpush3.bf16.msra.mxu0 %v405_v4  ;;  %876 = vmatpush3.bf16.msra.mxu1 %v405_v4 }
 0x1c9   :  { %v828_v5 = vpop.f32.mrb[8].mxu1  ;;  %840 = vmatprep.subr.bf16.mxu0 %v406_v2  ;;  %869 = vmatprep.subr.bf16.mxu1 %v406_v2 }
 0x1ca   :  { %v356_v6 = vpop.f32.mrb[9].mxu1 }
 0x1cb   :  { %v829_v7 = vpop.f32.mrb[10].mxu1 }
 0x1cc   :  { %v408_v8 = vpack.c.bf16 %v829_v7, %v828_v5  ;;  %v359_v9 = vpop.f32.mrb[11].mxu1  ;;  %841 = vmatpush3.bf16.msra.mxu0 %v406_v2  ;;  %877 = vmatpush3.bf16.msra.mxu1 %v406_v2 }
 0x1cd   :  { %v407_v10 = vpack.c.bf16 %v359_v9, %v356_v6 }
 0x1cf   :  { %842 = vmatprep.subr.bf16.mxu0 %v407_v10  ;;  %870 = vmatprep.subr.bf16.mxu1 %v407_v10 }
 0x1d0   :  { %843 = vmatpush3.bf16.msra.mxu0 %v407_v10  ;;  %878 = vmatpush3.bf16.msra.mxu1 %v407_v10 }
 0x1d1   :  { %v832_v11 = vpop.f32.mrb[12].mxu1  ;;  %844 = vmatprep.subr.bf16.mxu0 %v408_v8  ;;  %871 = vmatprep.subr.bf16.mxu1 %v408_v8 }
 0x1d2   :  { %v372_v12 = vpop.f32.mrb[13].mxu1 }
 0x1d3   :  { %v833_v13 = vpop.f32.mrb[14].mxu1 }
 0x1d4   :  { %v410_v14 = vpack.c.bf16 %v833_v13, %v832_v11  ;;  %v375_v15 = vpop.f32.mrb[15].mxu1  ;;  %845 = vmatpush3.bf16.msra.mxu0 %v408_v8  ;;  %879 = vmatpush3.bf16.msra.mxu1 %v408_v8 }
 0x1d5   :  { %v409_v16 = vpack.c.bf16 %v375_v15, %v372_v12 }
 0x1d7   :  { %846 = vmatprep.subr.bf16.mxu0 %v409_v16  ;;  %872 = vmatprep.subr.bf16.mxu1 %v409_v16 }
 0x1d8   :  { %847 = vmatpush3.bf16.msra.mxu0 %v409_v16  ;;  %880 = vmatpush3.bf16.msra.mxu1 %v409_v16 }
 0x1d9   :  { %848 = vmatprep.subr.bf16.mxu0 %v410_v14  ;;  %873 = vmatprep.subr.bf16.mxu1 %v410_v14 }
 0x1dc   :  { %849 = vmatpush3.bf16.msra.mxu0 %v410_v14  ;;  %881 = vmatpush3.bf16.msra.mxu1 %v410_v14 }
 0x1df   :  { %851 = vmatmul.mubr.bf16.vlgmr.msra.gmra.mrb[16].mxu0 %v897_v17  ;;  %863 = vmatmul.mubr.bf16.vlgmr.msra.gmra.mrb[16].mxu1 %v903_v18 }
 0x1e0   :  { %854 = vmatprep.mubr.bf16.mxu0 %v898_v19 }
 0x1e7   :  { %855 = vmatmul.mubr.bf16.gmra.mrb[20].mxu0 %v899_v20 }
 0x1e8   :  { %858 = vmatprep.mubr.bf16.mxu0 %v900_v21 }
 0x1ef   :  { %859 = vmatmul.mubr.bf16.gmra.mrb[24].mxu0 %v901_v22 }
 0x2b2   :  { %v852_v24 = vpop.f32.mrb[16].mxu0  ;;  %v1031_v25 = vpop.f32.mrb[16].mxu1 }
 0x2b3   :  { %v500_v26 = vpop.f32.mrb[17].mxu0  ;;  %v1033_v27 = vpop.f32.mrb[17].mxu1  ;;  %v1036_v28 = vadd.f32 %v852_v24, %v1029_v23 }
 0x2b4   :  { %v1039_v29 = vadd.f32 %v1029_v23, %v500_v26  ;;  %v853_v30 = vpop.f32.mrb[18].mxu0  ;;  %v1041_v31 = vpop.f32.mrb[18].mxu1 }
 0x2b5   :  { %v503_v32 = vpop.f32.mrb[19].mxu0  ;;  %v1043_v33 = vpop.f32.mrb[19].mxu1  ;;  %v1048_v35 = vadd.f32 %v853_v30, %v1029_v23  ;;  %v602_v37 = vmul.f32 %v1036_v28, %v1036_v28  ;;  %v566_v42 = vsel %vm103_vm0, %v1036_v28, 0.0 }
 0x2b6   :  { %v600_v34 = vmul.f32 %v1039_v29, %v1039_v29  ;;  %v1051_v36 = vadd.f32 %v1029_v23, %v503_v32  ;;  %v563_v38 = vsel %vm103_vm0, %v1039_v29, 0.0 }
 0x2b7   :  { %v603_v44 = vmul.f32 %v1048_v35, %v1048_v35  ;;  %v619_v50 = vsel %vm103_vm0, %v602_v37, 0.0  ;;  %v568_v51 = vsel %vm103_vm0, %v1048_v35, 0.0  ;;  %v1121_v37 = vadd.f32 %v1029_v23, %v1033_v27 }
 0x2b8   :  { %v564_v39 = vsel %vm103_vm0, %v1051_v36, 0.0  ;;  %v601_v40 = vmul.f32 %v1051_v36, %v1051_v36  ;;  %v616_v43 = vsel %vm103_vm0, %v600_v34, 0.0 }
 0x2b9   :  { %v565_v41 = vadd.f32 %v564_v39, %v563_v38  ;;  %v621_v58 = vsel %vm103_vm0, %v603_v44, 0.0 }
 0x2ba   :  { %v617_v45 = vsel %vm103_vm0, %v601_v40, 0.0  ;;  %v856_v46 = vpop.f32.mrb[20].mxu0 }
 0x2bb   :  { %v567_v47 = vadd.f32 %v566_v42, %v565_v41  ;;  %v618_v48 = vadd.f32 %v617_v45, %v616_v43  ;;  %v516_v49 = vpop.f32.mrb[21].mxu0  ;;  %v1074_v55 = vadd.f32 %v856_v46, %v1029_v23 }
 0x2bc   :  { %v1071_v52 = vadd.f32 %v1029_v23, %v516_v49  ;;  %v857_v53 = vpop.f32.mrb[22].mxu0  ;;  %v1139_v49 = vadd.f32 %v1029_v23, %v1043_v33 }
 0x2bd   :  { %v620_v54 = vadd.f32 %v619_v50, %v618_v48  ;;  %v569_v56 = vadd.f32 %v568_v51, %v567_v47  ;;  %v519_v57 = vpop.f32.mrb[23].mxu0  ;;  %v1085_v0 = vadd.f32 %v857_v53, %v1029_v23  ;;  %v606_v3 = vmul.f32 %v1074_v55, %v1074_v55 }
 0x2be   :  { %v570_v59 = vsel %vm103_vm0, %v1071_v52, 0.0  ;;  %v604_v60 = vmul.f32 %v1071_v52, %v1071_v52  ;;  %v1082_v61 = vadd.f32 %v1029_v23, %v519_v57  ;;  %v574_v7 = vsel %vm103_vm0, %v1074_v55, 0.0 }
 0x2bf   :  { %v571_v62 = vadd.f32 %v570_v59, %v569_v56  ;;  %v622_v63 = vadd.f32 %v621_v58, %v620_v54  ;;  %v607_v9 = vmul.f32 %v1085_v0, %v1085_v0  ;;  %v576_v13 = vsel %vm103_vm0, %v1085_v0, 0.0 }
 0x2c0   :  { %v623_v1 = vsel %vm103_vm0, %v604_v60, 0.0  ;;  %v572_v2 = vsel %vm103_vm0, %v1082_v61, 0.0  ;;  %v605_v6 = vmul.f32 %v1082_v61, %v1082_v61  ;;  %v627_v17 = vsel %vm103_vm0, %v606_v3, 0.0 }
 0x2c1   :  { %v624_v4 = vadd.f32 %v623_v1, %v622_v63  ;;  %v573_v5 = vadd.f32 %v572_v2, %v571_v62  ;;  %v629_v30 = vsel %vm103_vm0, %v607_v9, 0.0  ;;  %v612_v48 = vmul.f32 %v1121_v37, %v1121_v37 }
 0x2c2   :  { %v860_v8 = vpop.f32.mrb[24].mxu0  ;;  %v625_v11 = vsel %vm103_vm0, %v605_v6, 0.0  ;;  %v586_v53 = vsel %vm103_vm0, %v1121_v37, 0.0  ;;  %v1148_v56 = vadd.f32 %v1031_v25, %v1029_v23  ;;  %v1152_v59 = vadd.f32 %v1041_v31, %v1029_v23 }
 0x2c3   :  { %v575_v10 = vadd.f32 %v574_v7, %v573_v5  ;;  %v532_v12 = vpop.f32.mrb[25].mxu0  ;;  %v626_v14 = vadd.f32 %v625_v11, %v624_v4  ;;  %v1106_v18 = vadd.f32 %v860_v8, %v1029_v23  ;;  %v639_v62 = vsel %vm103_vm0, %v612_v48, 0.0 }
 0x2c4   :  { %v1102_v15 = vadd.f32 %v1029_v23, %v532_v12  ;;  %v861_v16 = vpop.f32.mrb[26].mxu0  ;;  %v613_v63 = vmul.f32 %v1139_v49, %v1139_v49  ;;  %v588_v2 = vsel %vm103_vm0, %v1139_v49, 0.0  ;;  %v614_v25 = vmul.f32 %v1148_v56, %v1148_v56 }
 0x2c5   :  { %v577_v19 = vadd.f32 %v576_v13, %v575_v10  ;;  %v535_v20 = vpop.f32.mrb[27].mxu0  ;;  %v628_v21 = vadd.f32 %v627_v17, %v626_v14  ;;  %v1117_v34 = vadd.f32 %v861_v16, %v1029_v23  ;;  %v610_v42 = vmul.f32 %v1106_v18, %v1106_v18 }
 0x2c6   :  { %v578_v22 = vsel %vm103_vm0, %v1102_v15, 0.0  ;;  %v608_v24 = vmul.f32 %v1102_v15, %v1102_v15  ;;  %v1113_v26 = vadd.f32 %v1029_v23, %v535_v20  ;;  %v582_v44 = vsel %vm103_vm0, %v1106_v18, 0.0 }
 0x2c7   :  { %v579_v32 = vadd.f32 %v578_v22, %v577_v19  ;;  %v630_v38 = vadd.f32 %v629_v30, %v628_v21  ;;  %v611_v46 = vmul.f32 %v1117_v34, %v1117_v34  ;;  %v584_v50 = vsel %vm103_vm0, %v1117_v34, 0.0 }
 0x2c8   :  { %v631_v39 = vsel %vm103_vm0, %v608_v24, 0.0  ;;  %v580_v40 = vsel %vm103_vm0, %v1113_v26, 0.0  ;;  %v609_v41 = vmul.f32 %v1113_v26, %v1113_v26  ;;  %v635_v54 = vsel %vm103_vm0, %v610_v42, 0.0 }
 0x2c9   :  { %v581_v43 = vadd.f32 %v580_v40, %v579_v32  ;;  %v632_v45 = vadd.f32 %v631_v39, %v630_v38  ;;  %v637_v33 = vsel %vm103_vm0, %v611_v46, 0.0  ;;  %v590_v23 = vsel %vm103_vm0, %v1148_v56, 0.0 }
 0x2ca   :  { %v633_v27 = vsel %vm103_vm0, %v609_v41, 0.0  ;;  %v615_v4 = vmul.f32 %v1152_v59, %v1152_v59  ;;  %v641_v6 = vsel %vm103_vm0, %v613_v63, 0.0  ;;  %v592_v7 = vsel %vm103_vm0, %v1152_v59, 0.0 }
 0x2cb   :  { %v583_v47 = vadd.f32 %v582_v44, %v581_v43  ;;  %v634_v51 = vadd.f32 %v633_v27, %v632_v45  ;;  %v643_v9 = vsel %vm103_vm0, %v614_v25, 0.0 }
 0x2cc   :  { %v645_v12 = vsel %vm103_vm0, %v615_v4, 0.0 }
 0x2cd   :  { %v585_v57 = vadd.f32 %v584_v50, %v583_v47  ;;  %v636_v58 = vadd.f32 %v635_v54, %v634_v51 }
 0x2cf   :  { %v587_v60 = vadd.f32 %v586_v53, %v585_v57  ;;  %v638_v1 = vadd.f32 %v637_v33, %v636_v58 }
 0x2d1   :  { %v589_v3 = vadd.f32 %v588_v2, %v587_v60  ;;  %v640_v31 = vadd.f32 %v639_v62, %v638_v1 }
 0x2d3   :  { %v591_v5 = vadd.f32 %v590_v23, %v589_v3  ;;  %v642_v8 = vadd.f32 %v641_v6, %v640_v31 }
 0x2d5   :  { %v593_v10 = vadd.f32 %v592_v7, %v591_v5  ;;  %v644_v11 = vadd.f32 %v643_v9, %v642_v8 }
 0x2d7   :  { %v594_v13 = vrot.slane %v593_v10, 4  ;;  %v646_v14 = vadd.f32 %v645_v12, %v644_v11 }
 0x2d9   :  { %v595_v16 = vadd.f32 %v594_v13, %v593_v10  ;;  %v647_v17 = vrot.slane %v646_v14, 4 }
 0x2db   :  { %v596_v19 = vrot.slane %v595_v16, 2  ;;  %v648_v20 = vadd.f32 %v647_v17, %v646_v14 }
 0x2dd   :  { %v597_v21 = vadd.f32 %v596_v19, %v595_v16  ;;  %v649_v22 = vrot.slane %v648_v20, 2 }
 0x2df   :  { %v598_v24 = vrot.slane %v597_v21, 1  ;;  %v650_v30 = vadd.f32 %v649_v22, %v648_v20 }
 0x2e1   :  { %v599_v32 = vadd.f32 %v598_v24, %v597_v21  ;;  %v651_v38 = vrot.slane %v650_v30, 1 }
 0x2e3   :  { %v653_v39 = vmul.f32 0.0078125, %v599_v32  ;;  %v652_v40 = vadd.f32 %v651_v38, %v650_v30 }
 0x2e5   :  { %v655_v41 = vmul.f32 %v653_v39, %v653_v39  ;;  %v658_v42 = vsub.f32 %v1039_v29, %v653_v39  ;;  %v659_v43 = vsub.f32 %v1051_v36, %v653_v39  ;;  %v660_v44 = vsub.f32 %v1036_v28, %v653_v39 }
 0x2e6   :  { %v654_v45 = vmul.f32 0.0078125, %v652_v40  ;;  %v661_v27 = vsub.f32 %v1048_v35, %v653_v39  ;;  %v662_v46 = vsub.f32 %v1071_v52, %v653_v39  ;;  %v663_v47 = vsub.f32 %v1082_v61, %v653_v39 }
 0x2e7   :  { %v664_v48 = vsub.f32 %v1074_v55, %v653_v39  ;;  %v665_v50 = vsub.f32 %v1085_v0, %v653_v39  ;;  %v666_v51 = vsub.f32 %v1102_v15, %v653_v39  ;;  %v667_v53 = vsub.f32 %v1113_v26, %v653_v39 }
 0x2e8   :  { %v656_v29 = vsub.f32 %v654_v45, %v655_v41  ;;  %v668_v36 = vsub.f32 %v1106_v18, %v653_v39  ;;  %v669_v28 = vsub.f32 %v1117_v34, %v653_v39  ;;  %v670_v54 = vsub.f32 %v1121_v37, %v653_v39 }
 0x2e9   :  { %v671_v35 = vsub.f32 %v1139_v49, %v653_v39  ;;  %v672_v52 = vsub.f32 %v1148_v56, %v653_v39  ;;  %v673_v61 = vsub.f32 %v1152_v59, %v653_v39 }
 0x2ea   :  { %v657_v55 = vmax.f32 %v656_v29, 0.0 }
 0x2ec   :  { %v674_v57 = vadd.f32 1e-05, %v657_v55 }
 0x2ee   :  { %904 = vrsqrt.f32 %v674_v57 }
 0x2f8   :  { %v905_v0 = vpop.eup %904 }
 0x2f9   :  { %v676_v15 = vmul.f32 %v905_v0, %v658_v42  ;;  %v677_v58 = vmul.f32 %v905_v0, %v659_v43  ;;  %v678_v26 = vmul.f32 %v905_v0, %v660_v44  ;;  %v679_v33 = vmul.f32 %v905_v0, %v661_v27 }
 0x2fa   :  { %v680_v60 = vmul.f32 %v905_v0, %v662_v46  ;;  %v681_v18 = vmul.f32 %v905_v0, %v663_v47  ;;  %v682_v62 = vmul.f32 %v905_v0, %v664_v48  ;;  %v683_v34 = vmul.f32 %v905_v0, %v665_v50 }
 0x2fb   :  { %v684_v63 = vmul.f32 %v905_v0, %v666_v51  ;;  %v685_v37 = vmul.f32 %v905_v0, %v667_v53  ;;  %v686_v1 = vmul.f32 %v905_v0, %v668_v36  ;;  %v687_v49 = vmul.f32 %v905_v0, %v669_v28  ;;  %692 = vst.msk [vmem:[%s1257_s6] sm:$0xff] %vm103_vm0, %v676_v15 }
 0x2fc   :  { %693 = vst.msk [vmem:[%s1257_s6 + $0x8] sm:$0xff] %vm103_vm0, %v677_v58  ;;  %694 = vst.msk [vmem:[%s1257_s6 + $0x10] sm:$0xff] %vm103_vm0, %v678_v26  ;;  %v688_v56 = vmul.f32 %v905_v0, %v670_v54  ;;  %v689_v59 = vmul.f32 %v905_v0, %v671_v35  ;;  %v690_v2 = vmul.f32 %v905_v0, %v672_v52 }
 0x2fd   :  { %695 = vst.msk [vmem:[%s1257_s6 + $0x18] sm:$0xff] %vm103_vm0, %v679_v33  ;;  %v691_v25 = vmul.f32 %v905_v0, %v673_v61  ;;  %696 = vst.msk [vmem:[%s1257_s6 + $0x20] sm:$0xff] %vm103_vm0, %v680_v60 }
 0x2fe   :  { %697 = vst.msk [vmem:[%s1257_s6 + $0x28] sm:$0xff] %vm103_vm0, %v681_v18  ;;  %698 = vst.msk [vmem:[%s1257_s6 + $0x30] sm:$0xff] %vm103_vm0, %v682_v62 }
 0x2ff   :  { %699 = vst.msk [vmem:[%s1257_s6 + $0x38] sm:$0xff] %vm103_vm0, %v683_v34  ;;  %700 = vst.msk [vmem:[%s1257_s6 + $0x40] sm:$0xff] %vm103_vm0, %v684_v63 }
 0x300   :  { %701 = vst.msk [vmem:[%s1257_s6 + $0x48] sm:$0xff] %vm103_vm0, %v685_v37  ;;  %702 = vst.msk [vmem:[%s1257_s6 + $0x50] sm:$0xff] %vm103_vm0, %v686_v1 }
 0x301   :  { %703 = vst.msk [vmem:[%s1257_s6 + $0x58] sm:$0xff] %vm103_vm0, %v687_v49  ;;  %704 = vst.msk [vmem:[%s1257_s6 + $0x60] sm:$0xff] %vm103_vm0, %v688_v56 }
 0x302   :  { %705 = vst.msk [vmem:[%s1257_s6 + $0x68] sm:$0xff] %vm103_vm0, %v689_v59  ;;  %706 = vst.msk [vmem:[%s1257_s6 + $0x70] sm:$0xff] %vm103_vm0, %v690_v2 }
 0x303   :  { %707 = vst.msk [vmem:[%s1257_s6 + $0x78] sm:$0xff] %vm103_vm0, %v691_v25 }

</bundles_post_ra>
